<compile_context>
chip_gen: v5e
topology: v5e:2x2
jax: 0.10.0
libtpu: 0.0.40
codegen_flags: <defaults>
</compile_context>

<pallas_src>
import functools

import jax
import jax.numpy as jnp
from jax.experimental import pallas as pl
from jax.experimental.pallas import tpu as pltpu

_LANE = 128
_SUBLANE = 8


def _round_up(x, m):
    return ((x + m - 1) // m) * m


def _mlp_fused_kernel(*refs, depth):
    """Fused MLP on one batch tile: h = x; repeat h = relu(h@W+b); out = h@Wf+bf.

    refs = (x_ref, w0_ref, b0_ref, ..., w_depth_ref, b_depth_ref, o_ref)
    Matmuls run on the MXU with f32 accumulation (bf16 inputs if the weights
    were pre-cast to bf16); bias-add / ReLU stay f32 on the VPU.
    """
    x_ref = refs[0]
    o_ref = refs[-1]
    param_refs = refs[1:-1]

    h = x_ref[...]
    for i in range(depth + 1):
        w = param_refs[2 * i][...]
        b = param_refs[2 * i + 1][...]
        h = jnp.dot(h.astype(w.dtype), w, preferred_element_type=jnp.float32)
        h = h + b.astype(jnp.float32)
        if i < depth:                       # hidden layers: ReLU activation
            h = jnp.maximum(h, 0.0)
    o_ref[...] = h.astype(o_ref.dtype)


def prepare_params(params, *, param_dtype=jnp.float32):
    """One-time (outside the hot path) parameter preparation.

    * Pads the final layer's output dim up to a multiple of 128 so the kernel's
      output slab is lane-dense (no masked vst, no per-call jnp.pad).
    * Optionally pre-casts weights to bf16 (halves weight DMA bytes + native
      bf16 MXU path).  Biases stay f32 so elementwise work stays f32.
    """
    depth = len(params) - 1
    prepared = []
    for i, (w, b) in enumerate(params):
        if i == depth:
            n = w.shape[1]
            n_pad = _round_up(n, _LANE)
            if n_pad != n:
                w = jnp.pad(w, ((0, 0), (0, n_pad - n)))
                b = jnp.pad(b, ((0, 0), (0, n_pad - n)))
        prepared.append((w.astype(param_dtype), b.astype(jnp.float32)))
    return prepared


def mlp_fused(x2d, params, n_classes, *, tm=512):
    """Run the whole MLP in one Pallas kernel, tiled over the batch dim.

    x2d:       (B, in_dim) flattened input (f32).
    params:    output of `prepare_params` — list of (W, b) with W:(in, out_pad),
               b:(1, out_pad); last layer is the classifier (no activation).
    n_classes: logical number of output classes (columns to keep).
    """
    depth = len(params) - 1
    B, in_dim = x2d.shape
    n_out = params[-1][0].shape[1]          # lane-padded classifier width

    # --- wrapper-side batch padding so every tile is sublane-aligned --------
    M_pad = _round_up(B, _SUBLANE)
    tm = min(tm, M_pad)                     # tiny batches -> single grid step
    M_pad = _round_up(M_pad, tm)
    if M_pad != B:
        x2d = jnp.pad(x2d, ((0, M_pad - B), (0, 0)))

    flat_args = [x2d]
    in_specs = [pl.BlockSpec((tm, in_dim), lambda i: (i, 0))]
    for w, b in params:
        flat_args.extend([w, b])
        # Weights/biases: constant index_map -> VMEM-resident across all steps.
        in_specs.append(pl.BlockSpec(w.shape, lambda i: (0, 0)))
        in_specs.append(pl.BlockSpec(b.shape, lambda i: (0, 0)))

    out = pl.pallas_call(
        functools.partial(_mlp_fused_kernel, depth=depth),
        out_shape=jax.ShapeDtypeStruct((M_pad, n_out), x2d.dtype),
        grid=(M_pad // tm,),
        in_specs=in_specs,
        out_specs=pl.BlockSpec((tm, n_out), lambda i: (i, 0)),
        compiler_params=pltpu.CompilerParams(
            dimension_semantics=("parallel",),   # batch tiles across v7x's 2 TCs
        ),
    )(*flat_args)

    return out[:B, :n_classes]


@functools.partial(jax.jit, static_argnames=("n_classes", "tm"))
def mlp_forward(x_nchw, params, *, n_classes, tm=512):
    B = x_nchw.shape[0]
    x2d = x_nchw.reshape(B, -1)                   # x.view(x.shape[0], -1)
    return mlp_fused(x2d, params, n_classes, tm=tm)


def init_mlp_params(key, in_dim, width, depth, num_classes, dtype=jnp.float32):
    """Deterministic init mirroring PyTorch nn.Linear default (U[-1/sqrt(fan_in), ...])."""
    params = []
    dims = [in_dim] + [width] * depth + [num_classes]
    for i in range(depth + 1):
        fan_in, fan_out = dims[i], dims[i + 1]
        key, kw, kb = jax.random.split(key, 3)
        bound = 1.0 / jnp.sqrt(fan_in)
        w = jax.random.uniform(kw, (fan_in, fan_out), dtype, -bound, bound)
        b = jax.random.uniform(kb, (1, fan_out), dtype, -bound, bound)
        params.append((w, b))
    return params


if __name__ == "__main__":
    # Synthetic settings (the module hardcodes 32x32 spatial in its first Linear)
    num_input_channels = 1
    width = 128
    depth = 2
    num_output_classes = 10
    B = 8

    key = jax.random.PRNGKey(0)
    kx, kp = jax.random.split(key)

    x = jax.random.normal(kx, (B, num_input_channels, 32, 32), jnp.float32)
    in_dim = num_input_channels * 32 * 32  # 1024
    params = init_mlp_params(kp, in_dim, width, depth, num_output_classes)

    # Pure-JAX f32 reference
    ref = x.reshape(B, -1)
    for w, b in params[:-1]:
        ref = jnp.maximum(ref @ w + b, 0.0)
    ref = ref @ params[-1][0] + params[-1][1]

    # f32 parameters (strict tolerance path)
    params_f32 = prepare_params(params, param_dtype=jnp.float32)
    y = mlp_forward(x, params_f32, n_classes=num_output_classes)
    jax.block_until_ready(y)
    assert y.shape == (B, num_output_classes)
    assert jnp.allclose(y, ref, atol=1e-4, rtol=1e-4)

    # bf16-weight path (half weight DMA bytes, native bf16 MXU, f32 accumulate).
    # Looser tolerance: bf16 mantissa limits accuracy to ~1e-2 relative.
    params_bf16 = prepare_params(params, param_dtype=jnp.bfloat16)
    y_bf16 = mlp_forward(x, params_bf16, n_classes=num_output_classes)
    jax.block_until_ready(y_bf16)
    assert jnp.allclose(y_bf16, ref, atol=1e-1, rtol=1e-1)

    print("KERNEL_OK")
</pallas_src>

<mosaic_0001>
module attributes {stable_mosaic.version = 11 : i64} {
  func.func @_mlp_fused_kernel(%arg0: i32, %arg1: memref<8x1024xf32, #tpu.memory_space<vmem>>, %arg2: memref<1024x128xf32, #tpu.memory_space<vmem>>, %arg3: memref<1x128xf32, #tpu.memory_space<vmem>>, %arg4: memref<128x128xf32, #tpu.memory_space<vmem>>, %arg5: memref<1x128xf32, #tpu.memory_space<vmem>>, %arg6: memref<128x128xf32, #tpu.memory_space<vmem>>, %arg7: memref<1x128xf32, #tpu.memory_space<vmem>>, %arg8: memref<8x128xf32, #tpu.memory_space<vmem>>) attributes {dimension_semantics = [#tpu.dimension_semantics<parallel>], iteration_bounds = array<i64: 1>, scalar_prefetch = 0 : i64, scratch_operands = 0 : i64, tpu.core_type = #tpu.core_type<tc>, window_params = [{transform_indices = @transform_0, window_bounds = array<i64: 8, 1024>}, {pipeline_mode = #tpu.pipeline_mode<synchronous>, transform_indices = @transform_1, window_bounds = array<i64: 1024, 128>}, {pipeline_mode = #tpu.pipeline_mode<synchronous>, transform_indices = @transform_2, window_bounds = array<i64: 1, 128>}, {pipeline_mode = #tpu.pipeline_mode<synchronous>, transform_indices = @transform_3, window_bounds = array<i64: 128, 128>}, {pipeline_mode = #tpu.pipeline_mode<synchronous>, transform_indices = @transform_4, window_bounds = array<i64: 1, 128>}, {pipeline_mode = #tpu.pipeline_mode<synchronous>, transform_indices = @transform_5, window_bounds = array<i64: 128, 128>}, {pipeline_mode = #tpu.pipeline_mode<synchronous>, transform_indices = @transform_6, window_bounds = array<i64: 1, 128>}, {transform_indices = @transform_7, window_bounds = array<i64: 8, 128>}]} {
    %c0 = arith.constant 0 : index
    %c0_0 = arith.constant 0 : index
    %0 = vector.load %arg1[%c0, %c0_0] : memref<8x1024xf32, #tpu.memory_space<vmem>>, vector<8x1024xf32>
    %c0_1 = arith.constant 0 : index
    %c0_2 = arith.constant 0 : index
    %1 = vector.load %arg2[%c0_1, %c0_2] : memref<1024x128xf32, #tpu.memory_space<vmem>>, vector<1024x128xf32>
    %c0_3 = arith.constant 0 : index
    %c0_4 = arith.constant 0 : index
    %2 = vector.load %arg3[%c0_3, %c0_4] : memref<1x128xf32, #tpu.memory_space<vmem>>, vector<1x128xf32>
    %cst = arith.constant dense<0.000000e+00> : vector<8x128xf32>
    %3 = tpu.matmul %0, %1, %cst {dimension_numbers = #tpu.dot_dimension_numbers<[1], [0], [0], [1], [0, 0, 1, 1], [], []>} : vector<8x1024xf32>, vector<1024x128xf32>, vector<8x128xf32> -> vector<8x128xf32>
    %4 = vector.broadcast %2 : vector<1x128xf32> to vector<8x128xf32>
    %5 = arith.addf %3, %4 : vector<8x128xf32>
    %cst_5 = arith.constant 0.000000e+00 : f32
    %6 = vector.broadcast %cst_5 : f32 to vector<8x128xf32>
    %7 = arith.maximumf %5, %6 : vector<8x128xf32>
    %c0_6 = arith.constant 0 : index
    %c0_7 = arith.constant 0 : index
    %8 = vector.load %arg4[%c0_6, %c0_7] : memref<128x128xf32, #tpu.memory_space<vmem>>, vector<128x128xf32>
    %c0_8 = arith.constant 0 : index
    %c0_9 = arith.constant 0 : index
    %9 = vector.load %arg5[%c0_8, %c0_9] : memref<1x128xf32, #tpu.memory_space<vmem>>, vector<1x128xf32>
    %cst_10 = arith.constant dense<0.000000e+00> : vector<8x128xf32>
    %10 = tpu.matmul %7, %8, %cst_10 {dimension_numbers = #tpu.dot_dimension_numbers<[1], [0], [0], [1], [0, 0, 1, 1], [], []>} : vector<8x128xf32>, vector<128x128xf32>, vector<8x128xf32> -> vector<8x128xf32>
    %11 = vector.broadcast %9 : vector<1x128xf32> to vector<8x128xf32>
    %12 = arith.addf %10, %11 : vector<8x128xf32>
    %cst_11 = arith.constant 0.000000e+00 : f32
    %13 = vector.broadcast %cst_11 : f32 to vector<8x128xf32>
    %14 = arith.maximumf %12, %13 : vector<8x128xf32>
    %c0_12 = arith.constant 0 : index
    %c0_13 = arith.constant 0 : index
    %15 = vector.load %arg6[%c0_12, %c0_13] : memref<128x128xf32, #tpu.memory_space<vmem>>, vector<128x128xf32>
    %c0_14 = arith.constant 0 : index
    %c0_15 = arith.constant 0 : index
    %16 = vector.load %arg7[%c0_14, %c0_15] : memref<1x128xf32, #tpu.memory_space<vmem>>, vector<1x128xf32>
    %cst_16 = arith.constant dense<0.000000e+00> : vector<8x128xf32>
    %17 = tpu.matmul %14, %15, %cst_16 {dimension_numbers = #tpu.dot_dimension_numbers<[1], [0], [0], [1], [0, 0, 1, 1], [], []>} : vector<8x128xf32>, vector<128x128xf32>, vector<8x128xf32> -> vector<8x128xf32>
    %18 = vector.broadcast %16 : vector<1x128xf32> to vector<8x128xf32>
    %19 = arith.addf %17, %18 : vector<8x128xf32>
    %c0_17 = arith.constant 0 : index
    %c0_18 = arith.constant 0 : index
    %20 = vector.load %arg8[%c0_17, %c0_18] : memref<8x128xf32, #tpu.memory_space<vmem>>, vector<8x128xf32>
    tpu.vector_store %arg8[%c0_17, %c0_18], %19 {strides = array<i32>} : memref<8x128xf32, #tpu.memory_space<vmem>>, vector<8x128xf32>,
    return
  }
  func.func @transform_0(%arg0: i32) -> (i32, i32) {
    %c0_i32 = arith.constant 0 : i32
    %c0_i32_0 = arith.constant 0 : i32
    return %arg0, %c0_i32 : i32, i32
  }
  func.func @transform_1(%arg0: i32) -> (i32, i32) {
    %c0_i32 = arith.constant 0 : i32
    %c0_i32_0 = arith.constant 0 : i32
    %c0_i32_1 = arith.constant 0 : i32
    return %c0_i32, %c0_i32_0 : i32, i32
  }
  func.func @transform_2(%arg0: i32) -> (i32, i32) {
    %c0_i32 = arith.constant 0 : i32
    %c0_i32_0 = arith.constant 0 : i32
    %c0_i32_1 = arith.constant 0 : i32
    return %c0_i32, %c0_i32_0 : i32, i32
  }
  func.func @transform_3(%arg0: i32) -> (i32, i32) {
    %c0_i32 = arith.constant 0 : i32
    %c0_i32_0 = arith.constant 0 : i32
    %c0_i32_1 = arith.constant 0 : i32
    return %c0_i32, %c0_i32_0 : i32, i32
  }
  func.func @transform_4(%arg0: i32) -> (i32, i32) {
    %c0_i32 = arith.constant 0 : i32
    %c0_i32_0 = arith.constant 0 : i32
    %c0_i32_1 = arith.constant 0 : i32
    return %c0_i32, %c0_i32_0 : i32, i32
  }
  func.func @transform_5(%arg0: i32) -> (i32, i32) {
    %c0_i32 = arith.constant 0 : i32
    %c0_i32_0 = arith.constant 0 : i32
    %c0_i32_1 = arith.constant 0 : i32
    return %c0_i32, %c0_i32_0 : i32, i32
  }
  func.func @transform_6(%arg0: i32) -> (i32, i32) {
    %c0_i32 = arith.constant 0 : i32
    %c0_i32_0 = arith.constant 0 : i32
    %c0_i32_1 = arith.constant 0 : i32
    return %c0_i32, %c0_i32_0 : i32, i32
  }
  func.func @transform_7(%arg0: i32) -> (i32, i32) {
    %c0_i32 = arith.constant 0 : i32
    %c0_i32_0 = arith.constant 0 : i32
    return %arg0, %c0_i32 : i32, i32
  }
}

</mosaic_0001>

<bundles_post_ra>
// kernel: mlp_forward.1
= control target key start
LH: loop header
LB: loop body
LE: loop exit
PB: predicated region body
PF: predicated region fallthrough
CT: control target
= control target key end

     0   :  { %12 = vsyncpa [#allocation3], 0  ;;  %s681_s0 = inlined_call_operand.vmem [shape: f32[8,1024], index: 0, kind: input, shape index: {}]   ;;  %s682_s1 = inlined_call_operand.hbm [shape: f32[1024,128], index: 1, kind: input, shape index: {}]   ;;  %s683_s2 = inlined_call_operand.vmem [shape: f32[1,128], index: 2, kind: input, shape index: {}]   ;;  %s684_s3 = inlined_call_operand.vmem [shape: f32[128,128], index: 3, kind: input, shape index: {}]   ;;  %s685_s4 = inlined_call_operand.vmem [shape: f32[1,128], index: 4, kind: input, shape index: {}]   ;;  %s686_s5 = inlined_call_operand.vmem [shape: f32[128,128], index: 5, kind: input, shape index: {}]   ;;  %s687_s6 = inlined_call_operand.vmem [shape: f32[1,128], index: 6, kind: input, shape index: {}]   ;;  %s688_s7 = inlined_call_operand.hbm [shape: f32[8,128], index: 7, kind: output, shape index: {}]  }
   0x1   :  { %13 = vsyncpa [#allocation4], 0  ;;  %s20_s26 = sshll.u32 %s682_s1, 4  ;;  %s502_s27 = smov [#allocation2]   ;;  %s21_s26 = int_to_ptr.hbm [resolvable:$true] %s20_s26 }
   0x2   :  { %s22_s28 = sshll.u32 %s502_s27, 4  ;;  %s503_s29 = smov 128   ;;  %s23_s28 = int_to_ptr.vmem [resolvable:$true] %s22_s28 }
   0x3   :  { %s504_s30 = smov 8  }
   0x4   :  { %28 = dma.hbm_to_vmem [thread:$0]  %s21_s26, 16384, %s23_s28, [#allocation3], %s503_s29, %s503_s29, %s504_s30  }
   0x5   :  { %498 = dma.done.wait [#allocation3], 16384  }
   0x6   :  { %499 = vsyncadd [#allocation3], 4294950912  ;;  %v98_v0 = vld [vmem:[#allocation2 + $0x178] sm:$0xff]  ;;  %v97_v2 = vld [vmem:[#allocation2 + $0x170] sm:$0xff]  ;;  %s505_s15 = smov [#allocation5]   ;;  %s433_s19 = sshll.u32 %s688_s7, 4  ;;  %s434_s19 = int_to_ptr.hbm [resolvable:$true] %s433_s19 }
   0x7   :  { %v66_v1 = vld [vmem:[#allocation2 + $0x78] sm:$0xff]  ;;  %223 = vmatpush.msra.mxu2 %v98_v0  ;;  %v65_v4 = vld [vmem:[#allocation2 + $0x70] sm:$0xff]  ;;  %v96_v6 = vld [vmem:[#allocation2 + $0x168] sm:$0xff]  ;;  %s431_s16 = sshll.u32 %s505_s15, 4  ;;  %s432_s16 = int_to_ptr.vmem [resolvable:$true] %s431_s16 }
   0x8   :  { %183 = vmatpush.msra.mxu0 %v66_v1  ;;  %v114_v3 = vld [vmem:[#allocation2 + $0x1f8] sm:$0xff]  ;;  %v113_v7 = vld [vmem:[#allocation2 + $0x1f0] sm:$0xff]  ;;  %v64_v8 = vld [vmem:[#allocation2 + $0x68] sm:$0xff] }
   0x9   :  { %v82_v5 = vld [vmem:[#allocation2 + $0xf8] sm:$0xff]  ;;  %243 = vmatpush.msra.mxu3 %v114_v3  ;;  %224 = vmatpush.msra.mxu2 %v97_v2  ;;  %v81_v9 = vld [vmem:[#allocation2 + $0xf0] sm:$0xff]  ;;  %v112_v10 = vld [vmem:[#allocation2 + $0x1e8] sm:$0xff] }
   0xa   :  { %203 = vmatpush.msra.mxu1 %v82_v5  ;;  %184 = vmatpush.msra.mxu0 %v65_v4  ;;  %v95_v11 = vld [vmem:[#allocation2 + $0x160] sm:$0xff]  ;;  %v80_v13 = vld [vmem:[#allocation2 + $0xe8] sm:$0xff]  ;;  %v94_v16 = vld [vmem:[#allocation2 + $0x158] sm:$0xff] }
   0xb   :  { %244 = vmatpush.msra.mxu3 %v113_v7  ;;  %v63_v12 = vld [vmem:[#allocation2 + $0x60] sm:$0xff]  ;;  %225 = vmatpush.msra.mxu2 %v96_v6  ;;  %v62_v17 = vld [vmem:[#allocation2 + $0x58] sm:$0xff]  ;;  %v93_v20 = vld [vmem:[#allocation2 + $0x150] sm:$0xff] }
   0xc   :  { %204 = vmatpush.msra.mxu1 %v81_v9  ;;  %185 = vmatpush.msra.mxu0 %v64_v8  ;;  %v111_v14 = vld [vmem:[#allocation2 + $0x1e0] sm:$0xff]  ;;  %v110_v18 = vld [vmem:[#allocation2 + $0x1d8] sm:$0xff]  ;;  %v61_v21 = vld [vmem:[#allocation2 + $0x50] sm:$0xff] }
   0xd   :  { %v79_v15 = vld [vmem:[#allocation2 + $0xe0] sm:$0xff]  ;;  %245 = vmatpush.msra.mxu3 %v112_v10  ;;  %226 = vmatpush.msra.mxu2 %v95_v11  ;;  %v78_v19 = vld [vmem:[#allocation2 + $0xd8] sm:$0xff]  ;;  %v109_v22 = vld [vmem:[#allocation2 + $0x1d0] sm:$0xff] }
   0xe   :  { %205 = vmatpush.msra.mxu1 %v80_v13  ;;  %186 = vmatpush.msra.mxu0 %v63_v12  ;;  %v77_v23 = vld [vmem:[#allocation2 + $0xd0] sm:$0xff]  ;;  %v92_v24 = vld [vmem:[#allocation2 + $0x148] sm:$0xff]  ;;  %v91_v28 = vld [vmem:[#allocation2 + $0x140] sm:$0xff] }
   0xf   :  { %246 = vmatpush.msra.mxu3 %v111_v14  ;;  %227 = vmatpush.msra.mxu2 %v94_v16  ;;  %v60_v25 = vld [vmem:[#allocation2 + $0x48] sm:$0xff]  ;;  %v59_v29 = vld [vmem:[#allocation2 + $0x40] sm:$0xff]  ;;  %v90_v32 = vld [vmem:[#allocation2 + $0x138] sm:$0xff] }
  0x10   :  { %206 = vmatpush.msra.mxu1 %v79_v15  ;;  %187 = vmatpush.msra.mxu0 %v62_v17  ;;  %v108_v26 = vld [vmem:[#allocation2 + $0x1c8] sm:$0xff]  ;;  %v107_v30 = vld [vmem:[#allocation2 + $0x1c0] sm:$0xff]  ;;  %v58_v33 = vld [vmem:[#allocation2 + $0x38] sm:$0xff] }
  0x11   :  { %247 = vmatpush.msra.mxu3 %v110_v18  ;;  %228 = vmatpush.msra.mxu2 %v93_v20  ;;  %v76_v27 = vld [vmem:[#allocation2 + $0xc8] sm:$0xff]  ;;  %v75_v31 = vld [vmem:[#allocation2 + $0xc0] sm:$0xff]  ;;  %v106_v34 = vld [vmem:[#allocation2 + $0x1b8] sm:$0xff] }
  0x12   :  { %207 = vmatpush.msra.mxu1 %v78_v19  ;;  %188 = vmatpush.msra.mxu0 %v61_v21  ;;  %v74_v35 = vld [vmem:[#allocation2 + $0xb8] sm:$0xff]  ;;  %v89_v36 = vld [vmem:[#allocation2 + $0x130] sm:$0xff]  ;;  %v88_v40 = vld [vmem:[#allocation2 + $0x128] sm:$0xff] }
  0x13   :  { %248 = vmatpush.msra.mxu3 %v109_v22  ;;  %229 = vmatpush.msra.mxu2 %v92_v24  ;;  %v57_v37 = vld [vmem:[#allocation2 + $0x30] sm:$0xff]  ;;  %v56_v41 = vld [vmem:[#allocation2 + $0x28] sm:$0xff]  ;;  %v87_v44 = vld [vmem:[#allocation2 + $0x120] sm:$0xff] }
  0x14   :  { %208 = vmatpush.msra.mxu1 %v77_v23  ;;  %189 = vmatpush.msra.mxu0 %v60_v25  ;;  %v105_v38 = vld [vmem:[#allocation2 + $0x1b0] sm:$0xff]  ;;  %v104_v42 = vld [vmem:[#allocation2 + $0x1a8] sm:$0xff]  ;;  %v55_v45 = vld [vmem:[#allocation2 + $0x20] sm:$0xff] }
  0x15   :  { %249 = vmatpush.msra.mxu3 %v108_v26  ;;  %230 = vmatpush.msra.mxu2 %v91_v28  ;;  %v73_v39 = vld [vmem:[#allocation2 + $0xb0] sm:$0xff]  ;;  %v72_v43 = vld [vmem:[#allocation2 + $0xa8] sm:$0xff]  ;;  %v103_v46 = vld [vmem:[#allocation2 + $0x1a0] sm:$0xff] }
  0x16   :  { %209 = vmatpush.msra.mxu1 %v76_v27  ;;  %190 = vmatpush.msra.mxu0 %v59_v29  ;;  %v71_v47 = vld [vmem:[#allocation2 + $0xa0] sm:$0xff]  ;;  %v86_v48 = vld [vmem:[#allocation2 + $0x118] sm:$0xff]  ;;  %v85_v52 = vld [vmem:[#allocation2 + $0x110] sm:$0xff] }
  0x17   :  { %250 = vmatpush.msra.mxu3 %v107_v30  ;;  %231 = vmatpush.msra.mxu2 %v90_v32  ;;  %v54_v49 = vld [vmem:[#allocation2 + $0x18] sm:$0xff]  ;;  %v53_v53 = vld [vmem:[#allocation2 + $0x10] sm:$0xff]  ;;  %v84_v56 = vld [vmem:[#allocation2 + $0x108] sm:$0xff] }
  0x18   :  { %210 = vmatpush.msra.mxu1 %v75_v31  ;;  %191 = vmatpush.msra.mxu0 %v58_v33  ;;  %v102_v50 = vld [vmem:[#allocation2 + $0x198] sm:$0xff]  ;;  %v101_v54 = vld [vmem:[#allocation2 + $0x190] sm:$0xff]  ;;  %v52_v57 = vld [vmem:[#allocation2 + $0x8] sm:$0xff] }
  0x19   :  { %251 = vmatpush.msra.mxu3 %v106_v34  ;;  %232 = vmatpush.msra.mxu2 %v89_v36  ;;  %v70_v51 = vld [vmem:[#allocation2 + $0x98] sm:$0xff]  ;;  %v69_v55 = vld [vmem:[#allocation2 + $0x90] sm:$0xff]  ;;  %v100_v58 = vld [vmem:[#allocation2 + $0x188] sm:$0xff] }
  0x1a   :  { %211 = vmatpush.msra.mxu1 %v74_v35  ;;  %192 = vmatpush.msra.mxu0 %v57_v37  ;;  %v68_v59 = vld [vmem:[#allocation2 + $0x88] sm:$0xff]  ;;  %v83_v60 = vld [vmem:[#allocation2 + $0x100] sm:$0xff]  ;;  %v162_v62 = vld [vmem:[#allocation2 + $0x378] sm:$0xff] }
  0x1b   :  { %252 = vmatpush.msra.mxu3 %v105_v38  ;;  %233 = vmatpush.msra.mxu2 %v88_v40  ;;  %v51_v61 = vld [vmem:[#allocation2] sm:$0xff]  ;;  %v130_v0 = vld [vmem:[#allocation2 + $0x278] sm:$0xff]  ;;  %v161_v2 = vld [vmem:[#allocation2 + $0x370] sm:$0xff] }
  0x1c   :  { %212 = vmatpush.msra.mxu1 %v73_v39  ;;  %193 = vmatpush.msra.mxu0 %v56_v41  ;;  %v99_v63 = vld [vmem:[#allocation2 + $0x180] sm:$0xff]  ;;  %v178_v1 = vld [vmem:[#allocation2 + $0x3f8] sm:$0xff]  ;;  %v129_v4 = vld [vmem:[#allocation2 + $0x270] sm:$0xff] }
  0x1d   :  { %253 = vmatpush.msra.mxu3 %v104_v42  ;;  %234 = vmatpush.msra.mxu2 %v87_v44  ;;  %v67_v3 = vld [vmem:[#allocation2 + $0x80] sm:$0xff]  ;;  %v146_v5 = vld [vmem:[#allocation2 + $0x2f8] sm:$0xff]  ;;  %v160_v6 = vld [vmem:[#allocation2 + $0x368] sm:$0xff] }
  0x1e   :  { %213 = vmatpush.msra.mxu1 %v72_v43  ;;  %194 = vmatpush.msra.mxu0 %v55_v45  ;;  %v177_v7 = vld [vmem:[#allocation2 + $0x3f0] sm:$0xff]  ;;  %v128_v8 = vld [vmem:[#allocation2 + $0x268] sm:$0xff]  ;;  %v159_v10 = vld [vmem:[#allocation2 + $0x360] sm:$0xff] }
  0x1f   :  { %254 = vmatpush.msra.mxu3 %v103_v46  ;;  %235 = vmatpush.msra.mxu2 %v86_v48  ;;  %v145_v9 = vld [vmem:[#allocation2 + $0x2f0] sm:$0xff]  ;;  %v176_v11 = vld [vmem:[#allocation2 + $0x3e8] sm:$0xff]  ;;  %v127_v12 = vld [vmem:[#allocation2 + $0x260] sm:$0xff] }
  0x20   :  { %214 = vmatpush.msra.mxu1 %v71_v47  ;;  %195 = vmatpush.msra.mxu0 %v54_v49  ;;  %v144_v13 = vld [vmem:[#allocation2 + $0x2e8] sm:$0xff]  ;;  %v158_v14 = vld [vmem:[#allocation2 + $0x358] sm:$0xff]  ;;  %v175_v15 = vld [vmem:[#allocation2 + $0x3e0] sm:$0xff] }
  0x21   :  { %255 = vmatpush.msra.mxu3 %v102_v50  ;;  %236 = vmatpush.msra.mxu2 %v85_v52  ;;  %v126_v16 = vld [vmem:[#allocation2 + $0x258] sm:$0xff]  ;;  %v143_v17 = vld [vmem:[#allocation2 + $0x2e0] sm:$0xff]  ;;  %v157_v18 = vld [vmem:[#allocation2 + $0x350] sm:$0xff] }
  0x22   :  { %215 = vmatpush.msra.mxu1 %v70_v51  ;;  %196 = vmatpush.msra.mxu0 %v53_v53  ;;  %v174_v19 = vld [vmem:[#allocation2 + $0x3d8] sm:$0xff]  ;;  %v125_v20 = vld [vmem:[#allocation2 + $0x250] sm:$0xff]  ;;  %v156_v22 = vld [vmem:[#allocation2 + $0x348] sm:$0xff] }
  0x23   :  { %256 = vmatpush.msra.mxu3 %v101_v54  ;;  %237 = vmatpush.msra.mxu2 %v84_v56  ;;  %v142_v21 = vld [vmem:[#allocation2 + $0x2d8] sm:$0xff]  ;;  %v173_v23 = vld [vmem:[#allocation2 + $0x3d0] sm:$0xff]  ;;  %v124_v24 = vld [vmem:[#allocation2 + $0x248] sm:$0xff] }
  0x24   :  { %216 = vmatpush.msra.mxu1 %v69_v55  ;;  %197 = vmatpush.msra.mxu0 %v52_v57  ;;  %v141_v25 = vld [vmem:[#allocation2 + $0x2d0] sm:$0xff]  ;;  %v155_v26 = vld [vmem:[#allocation2 + $0x340] sm:$0xff]  ;;  %v172_v27 = vld [vmem:[#allocation2 + $0x3c8] sm:$0xff] }
  0x25   :  { %257 = vmatpush.msra.mxu3 %v100_v58  ;;  %238 = vmatpush.msra.mxu2 %v83_v60  ;;  %v123_v28 = vld [vmem:[#allocation2 + $0x240] sm:$0xff]  ;;  %v140_v29 = vld [vmem:[#allocation2 + $0x2c8] sm:$0xff]  ;;  %v154_v30 = vld [vmem:[#allocation2 + $0x338] sm:$0xff] }
  0x26   :  { %217 = vmatpush.msra.mxu1 %v68_v59  ;;  %198 = vmatpush.msra.mxu0 %v51_v61  ;;  %v171_v31 = vld [vmem:[#allocation2 + $0x3c0] sm:$0xff]  ;;  %v122_v32 = vld [vmem:[#allocation2 + $0x238] sm:$0xff]  ;;  %v153_v34 = vld [vmem:[#allocation2 + $0x330] sm:$0xff] }
  0x27   :  { %303 = vmatpush.msrb.mxu2 %v162_v62  ;;  %258 = vmatpush.msra.mxu3 %v99_v63  ;;  %v139_v33 = vld [vmem:[#allocation2 + $0x2c0] sm:$0xff]  ;;  %v170_v35 = vld [vmem:[#allocation2 + $0x3b8] sm:$0xff]  ;;  %v121_v36 = vld [vmem:[#allocation2 + $0x230] sm:$0xff] }
  0x28   :  { %263 = vmatpush.msrb.mxu0 %v130_v0  ;;  %218 = vmatpush.msra.mxu1 %v67_v3  ;;  %v138_v37 = vld [vmem:[#allocation2 + $0x2b8] sm:$0xff]  ;;  %v152_v38 = vld [vmem:[#allocation2 + $0x328] sm:$0xff]  ;;  %v169_v39 = vld [vmem:[#allocation2 + $0x3b0] sm:$0xff] }
  0x29   :  { %323 = vmatpush.msrb.mxu3 %v178_v1  ;;  %304 = vmatpush.msrb.mxu2 %v161_v2  ;;  %v120_v40 = vld [vmem:[#allocation2 + $0x228] sm:$0xff]  ;;  %v137_v41 = vld [vmem:[#allocation2 + $0x2b0] sm:$0xff]  ;;  %v151_v42 = vld [vmem:[#allocation2 + $0x320] sm:$0xff] }
  0x2a   :  { %264 = vmatpush.msrb.mxu0 %v129_v4  ;;  %283 = vmatpush.msrb.mxu1 %v146_v5  ;;  %v168_v43 = vld [vmem:[#allocation2 + $0x3a8] sm:$0xff]  ;;  %v45_v44 = vld [vmem:[%s681_s0 + $0x10] sm:$0xff]  ;;  %v119_v45 = vld [vmem:[#allocation2 + $0x220] sm:$0xff] }
  0x2b   :  { %305 = vmatpush.msrb.mxu2 %v160_v6  ;;  %324 = vmatpush.msrb.mxu3 %v177_v7  ;;  %v136_v46 = vld [vmem:[#allocation2 + $0x2a8] sm:$0xff]  ;;  %v150_v47 = vld [vmem:[#allocation2 + $0x318] sm:$0xff]  ;;  %v167_v48 = vld [vmem:[#allocation2 + $0x3a0] sm:$0xff] }
  0x2c   :  { %265 = vmatpush.msrb.mxu0 %v128_v8  ;;  %284 = vmatpush.msrb.mxu1 %v145_v9  ;;  %v43_v49 = vld [vmem:[%s681_s0] sm:$0xff]  ;;  %v46_v50 = vld [vmem:[%s681_s0 + $0x18] sm:$0xff]  ;;  %v149_v53 = vld [vmem:[#allocation2 + $0x310] sm:$0xff] }
  0x2d   :  { %306 = vmatpush.msrb.mxu2 %v159_v10  ;;  %325 = vmatpush.msrb.mxu3 %v176_v11  ;;  %v118_v51 = vld [vmem:[#allocation2 + $0x218] sm:$0xff]  ;;  %v135_v52 = vld [vmem:[#allocation2 + $0x2a0] sm:$0xff]  ;;  %v44_v55 = vld [vmem:[%s681_s0 + $0x8] sm:$0xff] }
  0x2e   :  { %266 = vmatpush.msrb.mxu0 %v127_v12  ;;  %285 = vmatpush.msrb.mxu1 %v144_v13  ;;  %v166_v54 = vld [vmem:[#allocation2 + $0x398] sm:$0xff]  ;;  %v117_v56 = vld [vmem:[#allocation2 + $0x210] sm:$0xff]  ;;  %v148_v58 = vld [vmem:[#allocation2 + $0x308] sm:$0xff] }
  0x2f   :  { %307 = vmatpush.msrb.mxu2 %v158_v14  ;;  %326 = vmatpush.msrb.mxu3 %v175_v15  ;;  %v134_v57 = vld [vmem:[#allocation2 + $0x298] sm:$0xff]  ;;  %v165_v59 = vld [vmem:[#allocation2 + $0x390] sm:$0xff]  ;;  %v116_v60 = vld [vmem:[#allocation2 + $0x208] sm:$0xff] }
  0x30   :  { %267 = vmatpush.msrb.mxu0 %v126_v16  ;;  %286 = vmatpush.msrb.mxu1 %v143_v17  ;;  %v133_v61 = vld [vmem:[#allocation2 + $0x290] sm:$0xff]  ;;  %v147_v62 = vld [vmem:[#allocation2 + $0x300] sm:$0xff]  ;;  %v164_v63 = vld [vmem:[#allocation2 + $0x388] sm:$0xff] }
  0x31   :  { %308 = vmatpush.msrb.mxu2 %v157_v18  ;;  %327 = vmatpush.msrb.mxu3 %v174_v19  ;;  %v49_v0 = vld [vmem:[%s681_s0 + $0x30] sm:$0xff]  ;;  %v115_v1 = vld [vmem:[#allocation2 + $0x200] sm:$0xff]  ;;  %v132_v2 = vld [vmem:[#allocation2 + $0x288] sm:$0xff] }
  0x32   :  { %268 = vmatpush.msrb.mxu0 %v125_v20  ;;  %287 = vmatpush.msrb.mxu1 %v142_v21  ;;  %v163_v3 = vld [vmem:[#allocation2 + $0x380] sm:$0xff]  ;;  %v50_v5 = vld [vmem:[%s681_s0 + $0x38] sm:$0xff]  ;;  %v48_v8 = vld [vmem:[%s681_s0 + $0x28] sm:$0xff] }
  0x33   :  { %309 = vmatpush.msrb.mxu2 %v156_v22  ;;  %328 = vmatpush.msrb.mxu3 %v173_v23  ;;  %v47_v4 = vld [vmem:[%s681_s0 + $0x20] sm:$0xff]  ;;  %v359_v7 = vld [vmem:[%s684_s3 + $0x78] sm:$0xff]  ;;  %v358_v9 = vld [vmem:[%s684_s3 + $0x70] sm:$0xff] }
  0x34   :  { %269 = vmatpush.msrb.mxu0 %v124_v24  ;;  %288 = vmatpush.msrb.mxu1 %v141_v25  ;;  %v131_v6 = vld [vmem:[#allocation2 + $0x280] sm:$0xff]  ;;  %v357_v10 = vld [vmem:[%s684_s3 + $0x68] sm:$0xff]  ;;  %v355_v12 = vld [vmem:[%s684_s3 + $0x58] sm:$0xff] }
  0x35   :  { %310 = vmatpush.msrb.mxu2 %v155_v26  ;;  %329 = vmatpush.msrb.mxu3 %v172_v27  ;;  %v356_v11 = vld [vmem:[%s684_s3 + $0x60] sm:$0xff]  ;;  %v354_v13 = vld [vmem:[%s684_s3 + $0x50] sm:$0xff]  ;;  %v353_v14 = vld [vmem:[%s684_s3 + $0x48] sm:$0xff] }
  0x36   :  { %270 = vmatpush.msrb.mxu0 %v123_v28  ;;  %289 = vmatpush.msrb.mxu1 %v140_v29  ;;  %v352_v15 = vld [vmem:[%s684_s3 + $0x40] sm:$0xff]  ;;  %v351_v16 = vld [vmem:[%s684_s3 + $0x38] sm:$0xff]  ;;  %v350_v17 = vld [vmem:[%s684_s3 + $0x30] sm:$0xff] }
  0x37   :  { %311 = vmatpush.msrb.mxu2 %v154_v30  ;;  %330 = vmatpush.msrb.mxu3 %v171_v31  ;;  %v349_v18 = vld [vmem:[%s684_s3 + $0x28] sm:$0xff]  ;;  %v348_v19 = vld [vmem:[%s684_s3 + $0x20] sm:$0xff]  ;;  %v347_v20 = vld [vmem:[%s684_s3 + $0x18] sm:$0xff] }
  0x38   :  { %271 = vmatpush.msrb.mxu0 %v122_v32  ;;  %290 = vmatpush.msrb.mxu1 %v139_v33  ;;  %v346_v21 = vld [vmem:[%s684_s3 + $0x10] sm:$0xff]  ;;  %v345_v22 = vld [vmem:[%s684_s3 + $0x8] sm:$0xff]  ;;  %v344_v23 = vld [vmem:[%s684_s3] sm:$0xff] }
  0x39   :  { %312 = vmatpush.msrb.mxu2 %v153_v34  ;;  %331 = vmatpush.msrb.mxu3 %v170_v35  ;;  %v400_v24 = vld [vmem:[%s686_s5 + $0x78] sm:$0xff]  ;;  %v399_v25 = vld [vmem:[%s686_s5 + $0x70] sm:$0xff]  ;;  %v398_v26 = vld [vmem:[%s686_s5 + $0x68] sm:$0xff] }
  0x3a   :  { %272 = vmatpush.msrb.mxu0 %v121_v36  ;;  %291 = vmatpush.msrb.mxu1 %v138_v37  ;;  %v397_v27 = vld [vmem:[%s686_s5 + $0x60] sm:$0xff]  ;;  %v396_v28 = vld [vmem:[%s686_s5 + $0x58] sm:$0xff]  ;;  %v395_v30 = vld [vmem:[%s686_s5 + $0x50] sm:$0xff] }
  0x3b   :  { %313 = vmatpush.msrb.mxu2 %v152_v38  ;;  %332 = vmatpush.msrb.mxu3 %v169_v39  ;;  %v447_v29 = vld [vmem:[%s683_s2] ss:$0 sm:$0xff]  ;;  %v394_v31 = vld [vmem:[%s686_s5 + $0x48] sm:$0xff]  ;;  %v392_v36 = vld [vmem:[%s686_s5 + $0x38] sm:$0xff] }
  0x3c   :  { %273 = vmatpush.msrb.mxu0 %v120_v40  ;;  %292 = vmatpush.msrb.mxu1 %v137_v41  ;;  %v393_v34 = vld [vmem:[%s686_s5 + $0x40] sm:$0xff]  ;;  %v391_v39 = vld [vmem:[%s686_s5 + $0x30] sm:$0xff] }
  0x3d   :  { %314 = vmatpush.msrb.mxu2 %v151_v42  ;;  %333 = vmatpush.msrb.mxu3 %v168_v43  ;;  %v390_v42 = vld [vmem:[%s686_s5 + $0x28] sm:$0xff] }
  0x3e   :  { %239 = vmatmul.f32.vlgmr.msra.gmra.mxu2 %v45_v44  ;;  %274 = vmatpush.msrb.mxu0 %v119_v45  ;;  %v389_v44 = vld [vmem:[%s686_s5 + $0x20] sm:$0xff] }
  0x3f   :  { %293 = vmatpush.msrb.mxu1 %v136_v46  ;;  %315 = vmatpush.msrb.mxu2 %v150_v47  ;;  %v388_v47 = vld [vmem:[%s686_s5 + $0x18] sm:$0xff] }
  0x40   :  { %334 = vmatpush.msrb.mxu3 %v167_v48  ;;  %199 = vmatmul.f32.vlgmr.msra.gmra.mxu0 %v43_v49 }
  0x41   :  { %259 = vmatmul.f32.vlgmr.msra.gmra.mxu3 %v46_v50  ;;  %275 = vmatpush.msrb.mxu0 %v118_v51 }
  0x42   :  { %294 = vmatpush.msrb.mxu1 %v135_v52  ;;  %316 = vmatpush.msrb.mxu2 %v149_v53 }
  0x43   :  { %335 = vmatpush.msrb.mxu3 %v166_v54  ;;  %219 = vmatmul.f32.vlgmr.msra.gmra.mxu1 %v44_v55  ;;  %v387_v55 = vld [vmem:[%s686_s5 + $0x10] sm:$0xff] }
  0x44   :  { %276 = vmatpush.msrb.mxu0 %v117_v56  ;;  %295 = vmatpush.msrb.mxu1 %v134_v57  ;;  %v386_v56 = vld [vmem:[%s686_s5 + $0x8] sm:$0xff]  ;;  %v385_v57 = vld [vmem:[%s686_s5] sm:$0xff] }
  0x45   :  { %317 = vmatpush.msrb.mxu2 %v148_v58  ;;  %336 = vmatpush.msrb.mxu3 %v165_v59  ;;  %v448_v58 = vld [vmem:[%s685_s4] ss:$0 sm:$0xff] }
  0x46   :  { %277 = vmatpush.msrb.mxu0 %v116_v60  ;;  %296 = vmatpush.msrb.mxu1 %v133_v61 }
  0x47   :  { %318 = vmatpush.msrb.mxu2 %v147_v62  ;;  %337 = vmatpush.msrb.mxu3 %v164_v63  ;;  %v449_v62 = vld [vmem:[%s687_s6] ss:$0 sm:$0xff] }
  0x48   :  { %319 = vmatmul.f32.vlgmr.msrb.gmra.mxu2 %v49_v0  ;;  %278 = vmatpush.msrb.mxu0 %v115_v1 }
  0x49   :  { %297 = vmatpush.msrb.mxu1 %v132_v2  ;;  %338 = vmatpush.msrb.mxu3 %v163_v3 }
  0x4a   :  { %279 = vmatmul.f32.vlgmr.msrb.gmra.mxu0 %v47_v4  ;;  %339 = vmatmul.f32.vlgmr.msrb.gmra.mxu3 %v50_v5 }
  0x4b   :  { %298 = vmatpush.msrb.mxu1 %v131_v6  ;;  %364 = vmatpush.msra.mxu0 %v359_v7 }
  0x4c   :  { %299 = vmatmul.f32.vlgmr.msrb.gmra.mxu1 %v48_v8 }
  0x4d   :  { %365 = vmatpush.msra.mxu0 %v358_v9  ;;  %405 = vmatpush.msra.mxu1 %v400_v24 }
  0x4f   :  { %366 = vmatpush.msra.mxu0 %v357_v10  ;;  %406 = vmatpush.msra.mxu1 %v399_v25 }
  0x51   :  { %367 = vmatpush.msra.mxu0 %v356_v11  ;;  %407 = vmatpush.msra.mxu1 %v398_v26 }
  0x53   :  { %368 = vmatpush.msra.mxu0 %v355_v12  ;;  %408 = vmatpush.msra.mxu1 %v397_v27 }
  0x55   :  { %369 = vmatpush.msra.mxu0 %v354_v13  ;;  %409 = vmatpush.msra.mxu1 %v396_v28 }
  0x57   :  { %370 = vmatpush.msra.mxu0 %v353_v14  ;;  %410 = vmatpush.msra.mxu1 %v395_v30 }
  0x59   :  { %371 = vmatpush.msra.mxu0 %v352_v15  ;;  %411 = vmatpush.msra.mxu1 %v394_v31 }
  0x5b   :  { %372 = vmatpush.msra.mxu0 %v351_v16  ;;  %412 = vmatpush.msra.mxu1 %v393_v34 }
  0x5d   :  { %373 = vmatpush.msra.mxu0 %v350_v17  ;;  %413 = vmatpush.msra.mxu1 %v392_v36 }
  0x5f   :  { %374 = vmatpush.msra.mxu0 %v349_v18  ;;  %414 = vmatpush.msra.mxu1 %v391_v39 }
  0x61   :  { %375 = vmatpush.msra.mxu0 %v348_v19  ;;  %415 = vmatpush.msra.mxu1 %v390_v42 }
  0x63   :  { %376 = vmatpush.msra.mxu0 %v347_v20  ;;  %416 = vmatpush.msra.mxu1 %v389_v44 }
  0x65   :  { %377 = vmatpush.msra.mxu0 %v346_v21  ;;  %417 = vmatpush.msra.mxu1 %v388_v47 }
  0x67   :  { %378 = vmatpush.msra.mxu0 %v345_v22  ;;  %418 = vmatpush.msra.mxu1 %v387_v55 }
  0x69   :  { %379 = vmatpush.msra.mxu0 %v344_v23  ;;  %419 = vmatpush.msra.mxu1 %v386_v56 }
  0x6b   :  { %420 = vmatpush.msra.mxu1 %v385_v57 }
  0xbd   :  { %v200_v32 = vpop.f32.mrf.mxu0 }
  0xbe   :  { %v201_v33 = vadd.f32 %v447_v29, %v200_v32 }
  0xc0   :  { %v220_v35 = vpop.f32.mrf.mxu1 }
  0xc1   :  { %v221_v37 = vadd.f32 %v220_v35, %v201_v33  ;;  %v240_v38 = vpop.f32.mrf.mxu2 }
  0xc3   :  { %v241_v40 = vadd.f32 %v240_v38, %v221_v37 }
  0xc4   :  { %v260_v41 = vpop.f32.mrf.mxu3 }
  0xc5   :  { %v261_v43 = vadd.f32 %v260_v41, %v241_v40 }
  0xc7   :  { %v280_v45 = vpop.f32.mrf.mxu0 }
  0xc8   :  { %v281_v46 = vadd.f32 %v280_v45, %v261_v43 }
  0xc9   :  { %v300_v48 = vpop.f32.mrf.mxu1 }
  0xca   :  { %v301_v49 = vadd.f32 %v300_v48, %v281_v46 }
  0xcb   :  { %v320_v50 = vpop.f32.mrf.mxu2 }
  0xcc   :  { %v321_v51 = vadd.f32 %v320_v50, %v301_v49 }
  0xcd   :  { %v340_v52 = vpop.f32.mrf.mxu3 }
  0xce   :  { %v341_v53 = vadd.f32 %v340_v52, %v321_v51 }
  0xd0   :  { %v343_v54 = vmax.f32 %v341_v53, 0.0 }
  0xd2   :  { %380 = vmatmul.f32.vlgmr.msra.gmra.mxu0 %v343_v54 }
 0x14f   :  { %v381_v59 = vpop.f32.mrf.mxu0 }
 0x150   :  { %v382_v60 = vadd.f32 %v448_v58, %v381_v59 }
 0x152   :  { %v384_v61 = vmax.f32 %v382_v60, 0.0 }
 0x154   :  { %421 = vmatmul.f32.vlgmr.msra.gmra.mxu1 %v384_v61 }
 0x1d1   :  { %v422_v63 = vpop.f32.mrf.mxu1 }
 0x1d2   :  { %v423_v0 = vadd.f32 %v449_v62, %v422_v63 }
 0x1d4   :  { %425 = vst [vmem:[#allocation5] sm:$0xff] %v423_v0 }
 0x1d5   :  { %436 = dma.vmem_to_hbm [thread:$0]  %s432_s16, 128, %s434_s19, [#allocation4]  }
 0x1d6   :  { %500 = dma.done.wait [#allocation4], 128  }
 0x1d7   :  { %501 = vsyncadd [#allocation4], 4294967168 }
 0x1d8   :  { %441 = vsyncpa [#allocation3], 1 }
 0x1d9   :  { %442 = vsyncpa [#allocation4], 1 }

</bundles_post_ra>
